<compile_context>
chip_gen: v6e
topology: v6e:2x2x1
jax: 0.10.0
libtpu: 0.0.40
codegen_flags: <defaults>
</compile_context>

<pallas_src>
import functools

import jax
import jax.numpy as jnp
from jax.experimental import pallas as pl
from jax.experimental.pallas import tpu as pltpu

BN_EPS = 1e-5


# ----------------------------- fused kernel --------------------------------


def _make_fused_mlp_kernel(num_hidden, has_output):
    """Kernel refs = [x, (w0,b0), ..., (w_out,b_out)?, out]."""

    def kernel(*refs):
        x_ref = refs[0]
        o_ref = refs[-1]
        layer_refs = refs[1:-1]

        h = x_ref[...]                                   # bf16 batch tile
        for li in range(num_hidden):
            w_ref = layer_refs[2 * li]                   # bf16 (F_in, D), BN folded
            b_ref = layer_refs[2 * li + 1]               # f32  (1, D)
            y = jnp.dot(h, w_ref[...], preferred_element_type=jnp.float32)
            y = jnp.maximum(y + b_ref[...], 0.0)         # bias + ReLU in f32
            # TODO(synk): training-mode Dropout (stateful PRNG mask) not
            # implemented; eval-mode Dropout is the identity, reproduced here.
            # Only feed bf16 into the next MXU matmul; keep f32 otherwise.
            h = y.astype(jnp.bfloat16) if li < num_hidden - 1 else y

        if has_output:
            w_ref = layer_refs[2 * num_hidden]           # f32 (1, F_last)
            b_ref = layer_refs[2 * num_hidden + 1]       # f32 (1, 1)
            hf = h.astype(jnp.float32)
            # out_dim == 1: VPU multiply + lane reduction beats a 128-padded
            # MXU matmul and lets us store a narrow (tile_b, 1) block directly.
            y = jnp.sum(hf * w_ref[...], axis=-1, keepdims=True) + b_ref[...]
            o_ref[...] = y.astype(o_ref.dtype)
        else:
            o_ref[...] = h.astype(o_ref.dtype)

    return kernel


# ------------------------ one-time parameter prep ---------------------------


def prepare_mlp_params(hidden_params, out_params):
    """Fold eval-mode BatchNorm1d into each Linear (in f32), then cast hidden
    weights to bf16. Call ONCE; the per-call forward does no refolding."""
    flat = []
    for p in hidden_params:
        scale = p["gamma"] * jax.lax.rsqrt(p["var"] + BN_EPS)            # (1, D)
        w_f = (p["w"] * scale).astype(jnp.bfloat16)                      # (F_in, D)
        b_f = ((p["b"] - p["mean"]) * scale + p["beta"]).astype(jnp.float32)
        flat += [w_f, b_f]
    has_output = out_params is not None
    if has_output:
        flat += [jnp.asarray(out_params["w"], jnp.float32).T,            # (1, F_last)
                 jnp.asarray(out_params["b"], jnp.float32)]              # (1, 1)
    return tuple(flat), has_output


# ----------------------------- host-side wrapper ----------------------------


def _pick_tile_b(batch, max_tile_b=512):
    """Largest multiple-of-8 divisor of batch <= max_tile_b, preferring >= 2
    grid steps so both v7x TensorCores get work."""
    if batch <= 8 or batch % 8 != 0:
        return batch                      # small/ragged batch: one full block
    divs = [t for t in range(8, min(batch, max_tile_b) + 1, 8) if batch % t == 0]
    if not divs:
        return batch
    multi = [t for t in divs if batch // t >= 2]
    return max(multi) if multi else max(divs)


def _resident_spec(shape):
    """Constant-index (VMEM-resident) parameter block; single-buffered when
    the pipeline_mode API is available (saves VMEM, esp. on v7x's 64 MiB)."""
    try:
        return pl.BlockSpec(shape, lambda i: (0,) * len(shape),
                            pipeline_mode=pl.Buffered(1))
    except (TypeError, AttributeError):
        return pl.BlockSpec(shape, lambda i: (0,) * len(shape))


def mlp_forward(x, flat_params, *, num_hidden, has_output, max_tile_b=512):
    """Fused MLP forward. x: (B, F_in). Returns (B, 1) if has_output else (B, D_last)."""
    batch, f_in = x.shape
    tile_b = _pick_tile_b(batch, max_tile_b)
    assert batch % tile_b == 0, (batch, tile_b)
    grid = (batch // tile_b,)

    out_dim = 1 if has_output else int(flat_params[-1].shape[1])
    out_shape = jax.ShapeDtypeStruct((batch, out_dim), jnp.float32)

    # bf16 batch tile: MXU-native operand and half the per-step input DMA.
    x_bf = x.astype(jnp.bfloat16)

    in_specs = [pl.BlockSpec((tile_b, f_in), lambda i: (i, 0))]
    for a in flat_params:
        in_specs.append(_resident_spec(a.shape))
    out_specs = pl.BlockSpec((tile_b, out_dim), lambda i: (i, 0))

    # Explicit VMEM budget: params (worst case double-buffered) + double-
    # buffered x/out tiles + activation headroom; floored at the 32 MiB default
    # scoped limit, capped at v7x's 64 MiB physical VMEM.
    param_bytes = sum(a.size * a.dtype.itemsize for a in flat_params)
    widths = [f_in] + [int(flat_params[2 * i].shape[1]) for i in range(num_hidden)]
    act_bytes = tile_b * max(widths) * 4 * 4
    footprint = (2 * param_bytes + 2 * tile_b * f_in * 2
                 + 2 * tile_b * out_dim * 4 + act_bytes)
    vmem_limit = int(min(max(2 * footprint, 32 << 20), 64 << 20))

    kernel = _make_fused_mlp_kernel(num_hidden, has_output)
    return pl.pallas_call(
        kernel,
        out_shape=out_shape,
        grid=grid,
        in_specs=in_specs,
        out_specs=out_specs,
        compiler_params=pltpu.CompilerParams(
            dimension_semantics=("parallel",),
            vmem_limit_bytes=vmem_limit),
    )(x_bf, *flat_params)


# ------------------------- parameter construction --------------------------


def init_mlp_params(key, input_dim, embed_dims, output_layer=True):
    """Init mirroring PyTorch Linear defaults; BN stats randomized so the
    eval-mode BN folding is actually exercised."""
    params = []
    fan_in = input_dim
    for embed_dim in embed_dims:
        key, kw, kb, kg, kbe, km, kv = jax.random.split(key, 7)
        bound = 1.0 / jnp.sqrt(fan_in)
        w = jax.random.uniform(kw, (fan_in, embed_dim), jnp.float32, -bound, bound)
        b = jax.random.uniform(kb, (1, embed_dim), jnp.float32, -bound, bound)
        gamma = jax.random.uniform(kg, (1, embed_dim), jnp.float32, 0.5, 1.5)
        beta = 0.1 * jax.random.normal(kbe, (1, embed_dim), jnp.float32)
        run_mean = 0.1 * jax.random.normal(km, (1, embed_dim), jnp.float32)
        run_var = jax.random.uniform(kv, (1, embed_dim), jnp.float32, 0.5, 1.5)
        params.append(dict(w=w, b=b, gamma=gamma, beta=beta,
                           mean=run_mean, var=run_var))
        fan_in = embed_dim
    out_params = None
    if output_layer:
        key, kw, kb = jax.random.split(key, 3)
        bound = 1.0 / jnp.sqrt(fan_in)
        w = jax.random.uniform(kw, (fan_in, 1), jnp.float32, -bound, bound)
        b = jax.random.uniform(kb, (1, 1), jnp.float32, -bound, bound)
        out_params = dict(w=w, b=b)
    return params, out_params


def mlp_reference(x, hidden_params, out_params):
    """Pure-JAX f32 reference with *unfolded* BN (matches PyTorch eval forward)."""
    h = x
    for p in hidden_params:
        y = h @ p["w"] + p["b"]
        y = (y - p["mean"]) * jax.lax.rsqrt(p["var"] + BN_EPS) * p["gamma"] + p["beta"]
        h = jnp.maximum(y, 0.0)
    if out_params is not None:
        h = h @ out_params["w"] + out_params["b"]
    return h


# --------------------------------- main -------------------------------------


if __name__ == "__main__":
    key = jax.random.PRNGKey(0)
    k_in, k_par = jax.random.split(key)

    B, input_dim = 256, 32
    embed_dims = (64, 32)
    dropout = 0.1  # identity in eval mode

    x = jax.random.normal(k_in, (B, input_dim), jnp.float32)
    hidden_params, out_params = init_mlp_params(k_par, input_dim, embed_dims,
                                                output_layer=True)

    # One-time BN fold + bf16 cast (kept out of the per-call launch path).
    flat_params, has_output = prepare_mlp_params(hidden_params, out_params)

    fwd = jax.jit(functools.partial(mlp_forward,
                                    num_hidden=len(embed_dims),
                                    has_output=has_output))
    out = jax.block_until_ready(fwd(x, flat_params))

    ref = mlp_reference(x, hidden_params, out_params)
    assert out.shape == (B, 1), out.shape
    # bf16 weights/activations on the hidden matmuls (f32 accumulation):
    # tolerance loosened accordingly vs the pure-f32 reference.
    assert jnp.allclose(out, ref, atol=5e-2, rtol=5e-2), "mismatch vs reference"

    print("KERNEL_OK")
</pallas_src>

<mosaic_0001>
module attributes {stable_mosaic.version = 11 : i64} {
  func.func @kernel(%arg0: i32, %arg1: memref<128x32xbf16, #tpu.memory_space<vmem>>, %arg2: memref<32x64xbf16, #tpu.memory_space<vmem>>, %arg3: memref<1x64xf32, #tpu.memory_space<vmem>>, %arg4: memref<64x32xbf16, #tpu.memory_space<vmem>>, %arg5: memref<1x32xf32, #tpu.memory_space<vmem>>, %arg6: memref<1x32xf32, #tpu.memory_space<vmem>>, %arg7: memref<1x1xf32, #tpu.memory_space<vmem>>, %arg8: memref<128x1xf32, #tpu.memory_space<vmem>>) attributes {dimension_semantics = [#tpu.dimension_semantics<parallel>], iteration_bounds = array<i64: 2>, scalar_prefetch = 0 : i64, scratch_operands = 0 : i64, tpu.core_type = #tpu.core_type<tc>, window_params = [{transform_indices = @transform_0, window_bounds = array<i64: 128, 32>}, {pipeline_mode = #tpu.pipeline_mode<synchronous>, transform_indices = @transform_1, window_bounds = array<i64: 32, 64>}, {pipeline_mode = #tpu.pipeline_mode<synchronous>, transform_indices = @transform_2, window_bounds = array<i64: 1, 64>}, {pipeline_mode = #tpu.pipeline_mode<synchronous>, transform_indices = @transform_3, window_bounds = array<i64: 64, 32>}, {pipeline_mode = #tpu.pipeline_mode<synchronous>, transform_indices = @transform_4, window_bounds = array<i64: 1, 32>}, {pipeline_mode = #tpu.pipeline_mode<synchronous>, transform_indices = @transform_5, window_bounds = array<i64: 1, 32>}, {pipeline_mode = #tpu.pipeline_mode<synchronous>, transform_indices = @transform_6, window_bounds = array<i64: 1, 1>}, {transform_indices = @transform_7, window_bounds = array<i64: 128, 1>}]} {
    %c0 = arith.constant 0 : index
    %c0_0 = arith.constant 0 : index
    %0 = vector.load %arg1[%c0, %c0_0] : memref<128x32xbf16, #tpu.memory_space<vmem>>, vector<128x32xbf16>
    %c0_1 = arith.constant 0 : index
    %c0_2 = arith.constant 0 : index
    %1 = vector.load %arg2[%c0_1, %c0_2] : memref<32x64xbf16, #tpu.memory_space<vmem>>, vector<32x64xbf16>
    %cst = arith.constant dense<0.000000e+00> : vector<128x64xf32>
    %2 = tpu.matmul %0, %1, %cst {dimension_numbers = #tpu.dot_dimension_numbers<[1], [0], [0], [1], [0, 0, 1, 1], [], []>} : vector<128x32xbf16>, vector<32x64xbf16>, vector<128x64xf32> -> vector<128x64xf32>
    %c0_3 = arith.constant 0 : index
    %c0_4 = arith.constant 0 : index
    %3 = vector.load %arg3[%c0_3, %c0_4] : memref<1x64xf32, #tpu.memory_space<vmem>>, vector<1x64xf32>
    %4 = vector.broadcast %3 : vector<1x64xf32> to vector<128x64xf32>
    %5 = arith.addf %2, %4 : vector<128x64xf32>
    %cst_5 = arith.constant 0.000000e+00 : f32
    %6 = vector.broadcast %cst_5 : f32 to vector<128x64xf32>
    %7 = arith.maximumf %5, %6 : vector<128x64xf32>
    %8 = arith.truncf %7 : vector<128x64xf32> to vector<128x64xbf16>
    %c0_6 = arith.constant 0 : index
    %c0_7 = arith.constant 0 : index
    %9 = vector.load %arg4[%c0_6, %c0_7] : memref<64x32xbf16, #tpu.memory_space<vmem>>, vector<64x32xbf16>
    %cst_8 = arith.constant dense<0.000000e+00> : vector<128x32xf32>
    %10 = tpu.matmul %8, %9, %cst_8 {dimension_numbers = #tpu.dot_dimension_numbers<[1], [0], [0], [1], [0, 0, 1, 1], [], []>} : vector<128x64xbf16>, vector<64x32xbf16>, vector<128x32xf32> -> vector<128x32xf32>
    %c0_9 = arith.constant 0 : index
    %c0_10 = arith.constant 0 : index
    %11 = vector.load %arg5[%c0_9, %c0_10] : memref<1x32xf32, #tpu.memory_space<vmem>>, vector<1x32xf32>
    %12 = vector.broadcast %11 : vector<1x32xf32> to vector<128x32xf32>
    %13 = arith.addf %10, %12 : vector<128x32xf32>
    %cst_11 = arith.constant 0.000000e+00 : f32
    %14 = vector.broadcast %cst_11 : f32 to vector<128x32xf32>
    %15 = arith.maximumf %13, %14 : vector<128x32xf32>
    %c0_12 = arith.constant 0 : index
    %c0_13 = arith.constant 0 : index
    %16 = vector.load %arg6[%c0_12, %c0_13] : memref<1x32xf32, #tpu.memory_space<vmem>>, vector<1x32xf32>
    %17 = vector.broadcast %16 : vector<1x32xf32> to vector<128x32xf32>
    %18 = arith.mulf %15, %17 : vector<128x32xf32>
    %cst_14 = arith.constant dense<0.000000e+00> : vector<128xf32>
    %19 = vector.multi_reduction <add>, %18, %cst_14 [1] : vector<128x32xf32> to vector<128xf32>
    %20 = vector.shape_cast %19 : vector<128xf32> to vector<128x1xf32>
    %c0_15 = arith.constant 0 : index
    %c0_16 = arith.constant 0 : index
    %21 = vector.load %arg7[%c0_15, %c0_16] : memref<1x1xf32, #tpu.memory_space<vmem>>, vector<1x1xf32>
    %22 = vector.broadcast %21 : vector<1x1xf32> to vector<128x1xf32>
    %23 = arith.addf %20, %22 : vector<128x1xf32>
    %c0_17 = arith.constant 0 : index
    %c0_18 = arith.constant 0 : index
    %24 = vector.load %arg8[%c0_17, %c0_18] : memref<128x1xf32, #tpu.memory_space<vmem>>, vector<128x1xf32>
    tpu.vector_store %arg8[%c0_17, %c0_18], %23 {strides = array<i32>} : memref<128x1xf32, #tpu.memory_space<vmem>>, vector<128x1xf32>,
    return
  }
  func.func @transform_0(%arg0: i32) -> (i32, i32) {
    %c0_i32 = arith.constant 0 : i32
    %c0_i32_0 = arith.constant 0 : i32
    return %arg0, %c0_i32 : i32, i32
  }
  func.func @transform_1(%arg0: i32) -> (i32, i32) {
    %c0_i32 = arith.constant 0 : i32
    %c0_i32_0 = arith.constant 0 : i32
    %c0_i32_1 = arith.constant 0 : i32
    return %c0_i32, %c0_i32_0 : i32, i32
  }
  func.func @transform_2(%arg0: i32) -> (i32, i32) {
    %c0_i32 = arith.constant 0 : i32
    %c0_i32_0 = arith.constant 0 : i32
    %c0_i32_1 = arith.constant 0 : i32
    return %c0_i32, %c0_i32_0 : i32, i32
  }
  func.func @transform_3(%arg0: i32) -> (i32, i32) {
    %c0_i32 = arith.constant 0 : i32
    %c0_i32_0 = arith.constant 0 : i32
    %c0_i32_1 = arith.constant 0 : i32
    return %c0_i32, %c0_i32_0 : i32, i32
  }
  func.func @transform_4(%arg0: i32) -> (i32, i32) {
    %c0_i32 = arith.constant 0 : i32
    %c0_i32_0 = arith.constant 0 : i32
    %c0_i32_1 = arith.constant 0 : i32
    return %c0_i32, %c0_i32_0 : i32, i32
  }
  func.func @transform_5(%arg0: i32) -> (i32, i32) {
    %c0_i32 = arith.constant 0 : i32
    %c0_i32_0 = arith.constant 0 : i32
    %c0_i32_1 = arith.constant 0 : i32
    return %c0_i32, %c0_i32_0 : i32, i32
  }
  func.func @transform_6(%arg0: i32) -> (i32, i32) {
    %c0_i32 = arith.constant 0 : i32
    %c0_i32_0 = arith.constant 0 : i32
    %c0_i32_1 = arith.constant 0 : i32
    return %c0_i32, %c0_i32_0 : i32, i32
  }
  func.func @transform_7(%arg0: i32) -> (i32, i32) {
    %c0_i32 = arith.constant 0 : i32
    %c0_i32_0 = arith.constant 0 : i32
    return %arg0, %c0_i32 : i32, i32
  }
}

</mosaic_0001>

<bundles_post_ra>
// kernel: mlp_forward.1
= control target key start
LH: loop header
LB: loop body
LE: loop exit
PB: predicated region body
PF: predicated region fallthrough
CT: control target
= control target key end

     0   :  { %s1038_s26 = smov 0   ;;  %s1188_s0 = inlined_call_operand.vmem [shape: bf16[256,32], index: 0, kind: input, shape index: {}]   ;;  %s1189_s1 = inlined_call_operand.vmem [shape: bf16[32,64], index: 1, kind: input, shape index: {}]   ;;  %s1190_s2 = inlined_call_operand.vmem [shape: f32[1,64], index: 2, kind: input, shape index: {}]   ;;  %s1191_s3 = inlined_call_operand.vmem [shape: bf16[64,32], index: 3, kind: input, shape index: {}]   ;;  %s1192_s4 = inlined_call_operand.vmem [shape: f32[1,32], index: 4, kind: input, shape index: {}]   ;;  %s1193_s5 = inlined_call_operand.vmem [shape: f32[1,32], index: 5, kind: input, shape index: {}]   ;;  %s1194_s6 = inlined_call_operand.<no memory space> [shape: f32[1,1], index: 6, kind: input, shape index: {}]   ;;  %s1195_s7 = inlined_call_operand.vmem [shape: f32[256,1], index: 7, kind: output, shape index: {}]  }
   0x1   :  { %v12_v0 = vstv %s1194_s6 }
   0x2   :  { %13 = vst [vmem:[#allocation2] sm:$0x1] %v12_v0 }
   0x3 LB: > { %s854_s27 = sadd.s32 4294967295, %s993_s26   ;;  %p858_p0 = scmp.ge.s32.totalorder %s993_s26, 1  ;;  %s993_s26 = sphi %s1038_s26, %s19_s26  }
   0x4   : > { %p240_p1 = scmp.lt.s32.totalorder %s993_s26, 3 }
   0x6   : > { %p241_p2 = pnand %p858_p0, %p240_p1 }
   0x7   : > { %s859_s6 = sshll.u32 (!%p241_p2), %s854_s27, 4 }
   0x8   : > { %244 = sbr.rel (%p241_p2) target bundleno = 603 (0x25b), region = 48  ;;  %p273_p3 = scmp.lt.s32.totalorder (!%p241_p2), %s859_s6, 31 }
   0xd   : > { %v973_v1 = vld [vmem:[%s1189_s1 + $0x8] sm:$0xff]   ;;  %v974_v2 = vld [vmem:[%s1189_s1] sm:$0xff]   ;;  %v983_v3 = vld [vmem:[%s1191_s3 + $0x18] sm:$0xff]   ;;  %s1197_s6 = smov (!%p273_p3, %s859_s6), 31  ;;  %vm364_vm0 = vcmask 261120   ;;  %vm549_vm1 = vcmask 523264  }
   0xe   : > { %921 = vmatprep.subr.bf16.mxu0 %v973_v1  ;;  %941 = vmatprep.subr.bf16.mxu1 %v983_v3  ;;  %s860_s11 = sshll.u32 %s1197_s6, 2  ;;  %v984_v12 = vld [vmem:[%s1191_s3 + $0x10] sm:$0xff]   ;;  %v985_v13 = vld [vmem:[%s1191_s3 + $0x8] sm:$0xff]   ;;  %v986_v14 = vld [vmem:[%s1191_s3] sm:$0xff]   ;;  %s862_s28 = sshll.u32 %s1197_s6, 3  ;;  %vm781_vm2 = vcmask 7168  }
   0xf   : > { %922 = vmatpush3.bf16.msra.mxu0 %v973_v1  ;;  %942 = vmatpush3.bf16.msra.mxu1 %v983_v3  ;;  %s276_s14 = scalar_lea.vmem %s1188_s0, %s860_s11  ;;  %v863_v17 = vld [vmem:[%s1190_s2] ss:$0 sm:$0xff]  ;;  %s1151_s8 = scalar_lea.vmem %s1195_s7, %s862_s28 }
  0x10   : > { %923 = vmatprep.subr.bf16.mxu0 %v974_v2  ;;  %v975_v4 = vld [vmem:[%s276_s14] sm:$0xff]   ;;  %v976_v5 = vld [vmem:[%s276_s14 + $0x8] sm:$0xff]   ;;  %v977_v6 = vld [vmem:[%s276_s14 + $0x10] sm:$0xff]   ;;  %943 = vmatprep.subr.bf16.mxu1 %v984_v12 }
  0x11   : > { %925 = vmatprep.mubr.msk.bf16.mxu0 %vm364_vm0, %v975_v4  ;;  %v978_v7 = vld [vmem:[%s276_s14 + $0x18] sm:$0xff]   ;;  %v979_v8 = vld [vmem:[%s276_s14 + $0x20] sm:$0xff]   ;;  %v980_v9 = vld [vmem:[%s276_s14 + $0x28] sm:$0xff]  }
  0x12   : > { %v981_v10 = vld [vmem:[%s276_s14 + $0x30] sm:$0xff]   ;;  %v982_v11 = vld [vmem:[%s276_s14 + $0x38] sm:$0xff]  }
  0x13   : > { %924 = vmatpush3.bf16.msra.mxu0 %v974_v2  ;;  %944 = vmatpush3.bf16.msra.mxu1 %v984_v12  ;;  %v1098_v12 = vld [vmem:[%s1193_s5] ss:$0 sm:$0xff] }
  0x14   : > { %945 = vmatprep.subr.bf16.mxu1 %v985_v13 }
  0x16   : > { %926 = vmatmul.mubr.msk.bf16.vlgmr.msra.gmra.mxu0 %vm364_vm0, %v976_v5 }
  0x17   : > { %929 = vmatprep.mubr.msk.bf16.mxu0 %vm364_vm0, %v977_v6  ;;  %946 = vmatpush3.bf16.msra.mxu1 %v985_v13 }
  0x18   : > { %947 = vmatprep.subr.bf16.mxu1 %v986_v14 }
  0x1b   : > { %948 = vmatpush3.bf16.msra.mxu1 %v986_v14 }
  0x1e   : > { %930 = vmatmul.mubr.msk.bf16.gmra.mxu0 %vm364_vm0, %v978_v7 }
  0x1f   : > { %933 = vmatprep.mubr.msk.bf16.mxu0 %vm364_vm0, %v979_v8  ;;  %v1092_v8 = vld [vmem:[%s1192_s4] ss:$0 sm:$0xff] }
  0x26   : > { %934 = vmatmul.mubr.msk.bf16.gmra.mxu0 %vm364_vm0, %v980_v9 }
  0x27   : > { %937 = vmatprep.mubr.msk.bf16.mxu0 %vm364_vm0, %v981_v10 }
  0x2e   : > { %938 = vmatmul.mubr.msk.bf16.gmra.mxu0 %vm364_vm0, %v982_v11 }
  0xd6   : > { %v927_v15 = vpop.f32.mrf.mxu0 }
  0xd7   : > { %v432_v21 = vadd.f32 %v927_v15, %v863_v17 }
  0xd8   : > { %v423_v16 = vpop.f32.mrf.mxu0 }
  0xd9   : > { %v424_v19 = vadd.f32 %v863_v17, %v423_v16  ;;  %v488_v28 = vmax.f32 %v432_v21, 0.0 }
  0xda   : > { %v928_v18 = vpop.f32.mrf.mxu0 }
  0xdb   : > { %v435_v20 = vadd.f32 %v928_v18, %v863_v17  ;;  %v486_v26 = vmax.f32 %v424_v19, 0.0 }
  0xdc   : > { %v426_v22 = vpop.f32.mrf.mxu0 }
  0xdd   : > { %v427_v23 = vadd.f32 %v863_v17, %v426_v22  ;;  %v489_v24 = vmax.f32 %v435_v20, 0.0 }
  0xde   : > { %v931_v25 = vpop.f32.mrf.mxu0 }
  0xdf   : > { %v487_v27 = vmax.f32 %v427_v23, 0.0  ;;  %v503_v31 = vpack.c.bf16 %v489_v24, %v488_v28  ;;  %v448_v35 = vadd.f32 %v931_v25, %v863_v17 }
  0xe0   : > { %v439_v29 = vpop.f32.mrf.mxu0 }
  0xe1   : > { %v502_v30 = vpack.c.bf16 %v487_v27, %v486_v26  ;;  %v440_v33 = vadd.f32 %v863_v17, %v439_v29  ;;  %v492_v42 = vmax.f32 %v448_v35, 0.0 }
  0xe2   : > { %v932_v32 = vpop.f32.mrf.mxu0 }
  0xe3   : > { %v451_v34 = vadd.f32 %v932_v32, %v863_v17  ;;  %949 = vmatprep.mubr.msk.bf16.mxu1 %vm549_vm1, %v502_v30  ;;  %v490_v40 = vmax.f32 %v440_v33, 0.0 }
  0xe4   : > { %v442_v36 = vpop.f32.mrf.mxu0  ;;  %950 = vmatmul.mubr.msk.bf16.vlgmr.msra.gmra.mxu1 %vm549_vm1, %v503_v31 }
  0xe5   : > { %v443_v37 = vadd.f32 %v863_v17, %v442_v36  ;;  %v493_v38 = vmax.f32 %v451_v34, 0.0 }
  0xe6   : > { %v935_v39 = vpop.f32.mrf.mxu0 }
  0xe7   : > { %v491_v41 = vmax.f32 %v443_v37, 0.0  ;;  %v505_v45 = vpack.c.bf16 %v493_v38, %v492_v42  ;;  %v464_v49 = vadd.f32 %v935_v39, %v863_v17 }
  0xe8   : > { %v455_v43 = vpop.f32.mrf.mxu0 }
  0xe9   : > { %v504_v44 = vpack.c.bf16 %v491_v41, %v490_v40  ;;  %v456_v47 = vadd.f32 %v863_v17, %v455_v43  ;;  %v496_v56 = vmax.f32 %v464_v49, 0.0 }
  0xea   : > { %v936_v46 = vpop.f32.mrf.mxu0 }
  0xeb   : > { %v467_v48 = vadd.f32 %v936_v46, %v863_v17  ;;  %953 = vmatprep.mubr.msk.bf16.mxu1 %vm549_vm1, %v504_v44  ;;  %v494_v54 = vmax.f32 %v456_v47, 0.0 }
  0xec   : > { %v458_v50 = vpop.f32.mrf.mxu0  ;;  %954 = vmatmul.mubr.msk.bf16.gmra.mxu1 %vm549_vm1, %v505_v45 }
  0xed   : > { %v459_v51 = vadd.f32 %v863_v17, %v458_v50  ;;  %v497_v52 = vmax.f32 %v467_v48, 0.0 }
  0xee   : > { %v939_v53 = vpop.f32.mrf.mxu0 }
  0xef   : > { %v495_v55 = vmax.f32 %v459_v51, 0.0  ;;  %v507_v59 = vpack.c.bf16 %v497_v52, %v496_v56  ;;  %v480_v63 = vadd.f32 %v939_v53, %v863_v17 }
  0xf0   : > { %v471_v57 = vpop.f32.mrf.mxu0 }
  0xf1   : > { %v506_v58 = vpack.c.bf16 %v495_v55, %v494_v54  ;;  %v472_v61 = vadd.f32 %v863_v17, %v471_v57  ;;  %v500_v5 = vmax.f32 %v480_v63, 0.0 }
  0xf2   : > { %v940_v60 = vpop.f32.mrf.mxu0 }
  0xf3   : > { %v483_v62 = vadd.f32 %v940_v60, %v863_v17  ;;  %957 = vmatprep.mubr.msk.bf16.mxu1 %vm549_vm1, %v506_v58  ;;  %v498_v3 = vmax.f32 %v472_v61, 0.0 }
  0xf4   : > { %v474_v0 = vpop.f32.mrf.mxu0  ;;  %958 = vmatmul.mubr.msk.bf16.gmra.mxu1 %vm549_vm1, %v507_v59 }
  0xf5   : > { %v475_v1 = vadd.f32 %v863_v17, %v474_v0  ;;  %v501_v2 = vmax.f32 %v483_v62, 0.0 }
  0xf7   : > { %v499_v4 = vmax.f32 %v475_v1, 0.0  ;;  %v509_v7 = vpack.c.bf16 %v501_v2, %v500_v5 }
  0xf9   : > { %v508_v6 = vpack.c.bf16 %v499_v4, %v498_v3 }
  0xfb   : > { %961 = vmatprep.mubr.msk.bf16.mxu1 %vm549_vm1, %v508_v6 }
  0xfc   : > { %962 = vmatmul.mubr.msk.bf16.gmra.mxu1 %vm549_vm1, %v509_v7 }
 0x1a4   : > { %v951_v9 = vpop.f32.mrf.mxu1 }
 0x1a5   : > { %v617_v10 = vadd.f32 %v951_v9, %v1092_v8 }
 0x1a6   : > { %v608_v11 = vpop.f32.mrf.mxu1 }
 0x1a7   : > { %v673_v13 = vmax.f32 %v617_v10, 0.0  ;;  %v609_v14 = vadd.f32 %v1092_v8, %v608_v11 }
 0x1a8   : > { %v952_v15 = vpop.f32.mrf.mxu1 }
 0x1a9   : > { %v671_v16 = vmax.f32 %v609_v14, 0.0  ;;  %v620_v17 = vadd.f32 %v952_v15, %v1092_v8  ;;  %v696_v18 = vmul.f32 %v1098_v12, %v673_v13 }
 0x1aa   : > { %v611_v19 = vpop.f32.mrf.mxu1 }
 0x1ab   : > { %v674_v20 = vmax.f32 %v620_v17, 0.0  ;;  %v612_v21 = vadd.f32 %v1092_v8, %v611_v19  ;;  %v716_v22 = vsel %vm364_vm0, %v696_v18, 0.0  ;;  %v694_v23 = vmul.f32 %v1098_v12, %v671_v16 }
 0x1ac   : > { %717 = vadd.xlane.f32.xlu1 %v716_v22  ;;  %v955_v24 = vpop.f32.mrf.mxu1 }
 0x1ad   : > { %v672_v25 = vmax.f32 %v612_v21, 0.0  ;;  %v633_v26 = vadd.f32 %v955_v24, %v1092_v8  ;;  %v710_v27 = vsel %vm364_vm0, %v694_v23, 0.0  ;;  %v697_v28 = vmul.f32 %v1098_v12, %v674_v20 }
 0x1ae   : > { %v624_v29 = vpop.f32.mrf.mxu1  ;;  %711 = vadd.xlane.f32.xlu0 %v710_v27  ;;  %v896_v27 = vld [vmem:[#allocation2] ss:$0 sm:$0xff] }
 0x1af   : > { %v677_v30 = vmax.f32 %v633_v26, 0.0  ;;  %v625_v31 = vadd.f32 %v1092_v8, %v624_v29  ;;  %v719_v32 = vsel %vm364_vm0, %v697_v28, 0.0  ;;  %v695_v33 = vmul.f32 %v1098_v12, %v672_v25 }
 0x1b0   : > { %720 = vadd.xlane.f32.xlu1 %v719_v32  ;;  %v956_v34 = vpop.f32.mrf.mxu1 }
 0x1b1   : > { %v675_v35 = vmax.f32 %v625_v31, 0.0  ;;  %v636_v36 = vadd.f32 %v956_v34, %v1092_v8  ;;  %v713_v37 = vsel %vm364_vm0, %v695_v33, 0.0  ;;  %v700_v38 = vmul.f32 %v1098_v12, %v677_v30 }
 0x1b2   : > { %v627_v39 = vpop.f32.mrf.mxu1  ;;  %714 = vadd.xlane.f32.xlu0 %v713_v37 }
 0x1b3   : > { %v678_v40 = vmax.f32 %v636_v36, 0.0  ;;  %v628_v41 = vadd.f32 %v1092_v8, %v627_v39  ;;  %v728_v43 = vsel %vm364_vm0, %v700_v38, 0.0  ;;  %v698_v47 = vmul.f32 %v1098_v12, %v675_v35 }
 0x1b4   : > { %v959_v42 = vpop.f32.mrf.mxu1 }
 0x1b5   : > { %v676_v44 = vmax.f32 %v628_v41, 0.0  ;;  %v649_v45 = vadd.f32 %v959_v42, %v1092_v8  ;;  %v701_v46 = vmul.f32 %v1098_v12, %v678_v40  ;;  %v722_v56 = vsel %vm364_vm0, %v698_v47, 0.0 }
 0x1b6   : > { %v640_v48 = vpop.f32.mrf.mxu1  ;;  %729 = vadd.xlane.f32.xlu0 %v728_v43 }
 0x1b7   : > { %v681_v49 = vmax.f32 %v649_v45, 0.0  ;;  %v641_v50 = vadd.f32 %v1092_v8, %v640_v48  ;;  %v731_v51 = vsel %vm364_vm0, %v701_v46, 0.0  ;;  %v699_v52 = vmul.f32 %v1098_v12, %v676_v44 }
 0x1b8   : > { %732 = vadd.xlane.f32.xlu1 %v731_v51  ;;  %v960_v53 = vpop.f32.mrf.mxu1 }
 0x1b9   : > { %v679_v54 = vmax.f32 %v641_v50, 0.0  ;;  %v652_v55 = vadd.f32 %v960_v53, %v1092_v8  ;;  %v704_v57 = vmul.f32 %v1098_v12, %v681_v49  ;;  %v725_v61 = vsel %vm364_vm0, %v699_v52, 0.0 }
 0x1ba   : > { %v643_v58 = vpop.f32.mrf.mxu1  ;;  %723 = vadd.xlane.f32.xlu0 %v722_v56 }
 0x1bb   : > { %v682_v59 = vmax.f32 %v652_v55, 0.0  ;;  %v644_v60 = vadd.f32 %v1092_v8, %v643_v58  ;;  %v740_v63 = vsel %vm364_vm0, %v704_v57, 0.0  ;;  %v702_v3 = vmul.f32 %v1098_v12, %v679_v54 }
 0x1bc   : > { %v963_v62 = vpop.f32.mrf.mxu1  ;;  %726 = vadd.xlane.f32.xlu1 %v725_v61 }
 0x1bd   : > { %v680_v0 = vmax.f32 %v644_v60, 0.0  ;;  %v665_v1 = vadd.f32 %v963_v62, %v1092_v8  ;;  %v705_v2 = vmul.f32 %v1098_v12, %v682_v59  ;;  %v734_v14 = vsel %vm364_vm0, %v702_v3, 0.0 }
 0x1be   : > { %v656_v4 = vpop.f32.mrf.mxu1  ;;  %741 = vadd.xlane.f32.xlu0 %v740_v63 }
 0x1bf   : > { %v657_v5 = vadd.f32 %v1092_v8, %v656_v4  ;;  %v743_v6 = vsel %vm364_vm0, %v705_v2, 0.0  ;;  %v703_v7 = vmul.f32 %v1098_v12, %v680_v0  ;;  %v685_v10 = vmax.f32 %v665_v1, 0.0 }
 0x1c0   : > { %v964_v9 = vpop.f32.mrf.mxu1  ;;  %744 = vadd.xlane.f32.xlu1 %v743_v6 }
 0x1c1   : > { %v683_v11 = vmax.f32 %v657_v5, 0.0  ;;  %v668_v13 = vadd.f32 %v964_v9, %v1092_v8  ;;  %v737_v17 = vsel %vm364_vm0, %v703_v7, 0.0  ;;  %v708_v22 = vmul.f32 %v1098_v12, %v685_v10 }
 0x1c2   : > { %v659_v15 = vpop.f32.mrf.mxu1  ;;  %735 = vadd.xlane.f32.xlu0 %v734_v14 }
 0x1c3   : > { %v660_v16 = vadd.f32 %v1092_v8, %v659_v15  ;;  %v706_v18 = vmul.f32 %v1098_v12, %v683_v11  ;;  %v686_v19 = vmax.f32 %v668_v13, 0.0  ;;  %v752_v25 = vsel %vm364_vm0, %v708_v22, 0.0 }
 0x1c4   : > { %738 = vadd.xlane.f32.xlu1 %v737_v17 }
 0x1c5   : > { %v684_v20 = vmax.f32 %v660_v16, 0.0  ;;  %v746_v21 = vsel %vm364_vm0, %v706_v18, 0.0  ;;  %v709_v8 = vmul.f32 %v1098_v12, %v686_v19 }
 0x1c6   : > { %747 = vadd.xlane.f32.xlu0 %v746_v21 }
 0x1c7   : > { %v707_v23 = vmul.f32 %v1098_v12, %v684_v20  ;;  %v755_v26 = vsel %vm364_vm0, %v709_v8, 0.0 }
 0x1c9   : > { %v749_v24 = vsel %vm364_vm0, %v707_v23, 0.0 }
 0x1ca   : > { %750 = vadd.xlane.f32.xlu1 %v749_v24  ;;  %753 = vadd.xlane.f32.xlu0 %v752_v25 }
 0x1ce   : > { %756 = vadd.xlane.f32.xlu1 %v755_v26 }
 0x235   : > { %v718_v28 = vpop.xlane.xlu1 %717 }
 0x236   : > { %v767_v12 = vadd.f32 %v896_v27, %v718_v28 }
 0x237   : > { %v712_v29 = vpop.xlane.xlu0 %711 }
 0x238   : > { %784 = vst.msk [vmem:[%s1151_s8 + $0x10] sm:$0xff] %vm781_vm2, %v767_v12  ;;  %v765_v30 = vadd.f32 %v896_v27, %v712_v29 }
 0x239   : > { %v721_v31 = vpop.xlane.xlu1 %720 }
 0x23a   : > { %782 = vst.msk [vmem:[%s1151_s8] sm:$0xff] %vm781_vm2, %v765_v30  ;;  %v768_v32 = vadd.f32 %v896_v27, %v721_v31 }
 0x23b   : > { %v715_v33 = vpop.xlane.xlu0 %714 }
 0x23c   : > { %785 = vst.msk [vmem:[%s1151_s8 + $0x18] sm:$0xff] %vm781_vm2, %v768_v32  ;;  %v766_v34 = vadd.f32 %v896_v27, %v715_v33 }
 0x23e   : > { %783 = vst.msk [vmem:[%s1151_s8 + $0x8] sm:$0xff] %vm781_vm2, %v766_v34 }
 0x23f   : > { %v730_v35 = vpop.xlane.xlu0 %729 }
 0x240   : > { %v771_v36 = vadd.f32 %v896_v27, %v730_v35 }
 0x241   : > { %v733_v37 = vpop.xlane.xlu1 %732 }
 0x242   : > { %788 = vst.msk [vmem:[%s1151_s8 + $0x30] sm:$0xff] %vm781_vm2, %v771_v36  ;;  %v772_v38 = vadd.f32 %v896_v27, %v733_v37 }
 0x243   : > { %v724_v39 = vpop.xlane.xlu0 %723 }
 0x244   : > { %789 = vst.msk [vmem:[%s1151_s8 + $0x38] sm:$0xff] %vm781_vm2, %v772_v38  ;;  %v769_v40 = vadd.f32 %v896_v27, %v724_v39 }
 0x245   : > { %v727_v41 = vpop.xlane.xlu1 %726 }
 0x246   : > { %786 = vst.msk [vmem:[%s1151_s8 + $0x20] sm:$0xff] %vm781_vm2, %v769_v40  ;;  %v770_v42 = vadd.f32 %v896_v27, %v727_v41 }
 0x247   : > { %v742_v43 = vpop.xlane.xlu0 %741 }
 0x248   : > { %787 = vst.msk [vmem:[%s1151_s8 + $0x28] sm:$0xff] %vm781_vm2, %v770_v42  ;;  %v775_v44 = vadd.f32 %v896_v27, %v742_v43 }
 0x249   : > { %v745_v45 = vpop.xlane.xlu1 %744 }
 0x24a   : > { %792 = vst.msk [vmem:[%s1151_s8 + $0x50] sm:$0xff] %vm781_vm2, %v775_v44  ;;  %v776_v46 = vadd.f32 %v896_v27, %v745_v45 }
 0x24b   : > { %v736_v47 = vpop.xlane.xlu0 %735 }
 0x24c   : > { %793 = vst.msk [vmem:[%s1151_s8 + $0x58] sm:$0xff] %vm781_vm2, %v776_v46  ;;  %v773_v48 = vadd.f32 %v896_v27, %v736_v47 }
 0x24d   : > { %v739_v49 = vpop.xlane.xlu1 %738 }
 0x24e   : > { %790 = vst.msk [vmem:[%s1151_s8 + $0x40] sm:$0xff] %vm781_vm2, %v773_v48  ;;  %v774_v50 = vadd.f32 %v896_v27, %v739_v49 }
 0x24f   : > { %v748_v51 = vpop.xlane.xlu0 %747 }
 0x250   : > { %791 = vst.msk [vmem:[%s1151_s8 + $0x48] sm:$0xff] %vm781_vm2, %v774_v50  ;;  %v777_v52 = vadd.f32 %v896_v27, %v748_v51 }
 0x252   : > { %794 = vst.msk [vmem:[%s1151_s8 + $0x60] sm:$0xff] %vm781_vm2, %v777_v52 }
 0x253   : > { %v751_v53 = vpop.xlane.xlu1 %750  ;;  %v754_v54 = vpop.xlane.xlu0 %753 }
 0x254   : > { %v778_v55 = vadd.f32 %v896_v27, %v751_v53  ;;  %v779_v56 = vadd.f32 %v896_v27, %v754_v54 }
 0x256   : > { %795 = vst.msk [vmem:[%s1151_s8 + $0x68] sm:$0xff] %vm781_vm2, %v778_v55  ;;  %796 = vst.msk [vmem:[%s1151_s8 + $0x70] sm:$0xff] %vm781_vm2, %v779_v56 }
 0x257   : > { %v757_v57 = vpop.xlane.xlu1 %756 }
 0x258   : > { %v780_v58 = vadd.f32 %v896_v27, %v757_v57 }
 0x25a   : > { %797 = vst.msk [vmem:[%s1151_s8 + $0x78] sm:$0xff] %vm781_vm2, %v780_v58 }
 0x25b PF: > { %s19_s26 = sadd.s32 1, %s993_s26  }
 0x25c   : > { %p16_p4 = scmp.ge.s32.totalorder %s19_s26, 4  }
 0x25e   :  { %18 = sbr.rel (!%p16_p4) target bundleno = 3 (0x3), region = 78 }

</bundles_post_ra>
